<compile_context>
chip_gen: v6e
topology: v6e:2x2x1
jax: 0.10.0
libtpu: 0.0.40
codegen_flags: <defaults>
</compile_context>

<pallas_src>
import math

import jax
import jax.numpy as jnp
from jax.experimental import pallas as pl
from jax.experimental.pallas import tpu as pltpu


def _tanh_attention_kernel(h_ref, mask_ref, w1_ref, b1_ref, w2_ref,
                           out_ref, acc_ref):
    # h_ref:    (Bt, Sp, Hk)   bf16/f32 block of hidden (batch rows x K slice)
    # mask_ref: (Bt, Sp)       int32, nonzero => masked out (-inf)
    # w1_ref:   (Hk, Hh)       K-slice of attn1.weight^T
    # b1_ref:   (1, Hh)        attn1.bias (f32)
    # w2_ref:   (1, Hh)        attn2.weight row (f32)
    # out_ref:  (Bt, Sp)       softmax weights (f32)
    # acc_ref:  (Bt*Sp, Hh)    f32 accumulator for the first projection
    k = pl.program_id(1)

    @pl.when(k == 0)
    def _init():
        acc_ref[...] = jnp.zeros_like(acc_ref)

    bt, sp, hk = h_ref.shape
    hh = w1_ref.shape[1]

    # First projection on the MXU: (Bt*Sp, Hk) @ (Hk, Hh), f32 accumulation.
    h2d = h_ref[...].reshape(bt * sp, hk)
    acc_ref[...] += jnp.dot(h2d, w1_ref[...],
                            preferred_element_type=jnp.float32)

    @pl.when(k == pl.num_programs(1) - 1)
    def _finalize():
        a1 = jnp.tanh(acc_ref[...] + b1_ref[...])                # (Bt*Sp, Hh)
        # Second projection (output width 1): VPU multiply + cross-lane reduce
        # instead of a wasted N=1 MXU push.
        contrib = (a1 * w2_ref[...]).reshape(bt, sp, hh)
        logits = jnp.sum(contrib, axis=-1)                       # (Bt, Sp)

        # Masked softmax over the (lane-dense) sequence axis.
        masked = jnp.where(mask_ref[...] != 0, jnp.float32(-jnp.inf), logits)
        mx = jnp.max(masked, axis=-1, keepdims=True)
        e = jnp.exp(masked - mx)
        denom = jnp.sum(e, axis=-1, keepdims=True)
        inv = pl.reciprocal(denom, approx=True)                  # EUP slot
        out_ref[...] = (e * inv).astype(out_ref.dtype)


def _vmem_capacity_bytes():
    """Per-core VMEM capacity; conservative v7x fallback if query fails."""
    try:
        info = pltpu.get_tpu_info()
        cap = getattr(info, "vmem_capacity_bytes", None)
        if cap:
            return int(cap)
    except Exception:
        pass
    return 64 * 1024 * 1024


def _pick_blocks(B, S_pad, H, Hh, in_itemsize, budget_bytes):
    """Choose (Bt, Hk) block sizes and return (bt, hk, footprint_bytes).

    Constraints:
      * Bt divides B and is either == B or a multiple of 8 (mask/out second-
        to-last dim of the (Bt, Sp) blocks must satisfy the (8,128) rule).
      * Hk divides H and is either == H or a multiple of 128 (last dim of the
        hidden block / second-to-last of the w1 block).
    Preference: >=4 batch steps (2 per v7x TC), then >=2, then anything;
    within a tier maximize Bt (amortize per-step overhead), then Hk.
    """
    bt_cands = sorted((d for d in range(1, B + 1)
                       if B % d == 0 and (d == B or d % 8 == 0)), reverse=True)
    if H % 128 == 0:
        hk_cands = sorted((d for d in range(128, H + 1, 128) if H % d == 0),
                          reverse=True)
    else:
        hk_cands = [H]

    def footprint(bt, hk):
        dbl = 2  # BlockSpec double-buffering (applies to weights too)
        return (bt * S_pad * hk * in_itemsize * dbl   # hidden stream
                + bt * S_pad * 4 * dbl * 2            # mask + out blocks
                + hk * Hh * in_itemsize * dbl         # w1 block
                + 2 * Hh * 4 * dbl                    # b1 + w2
                + bt * S_pad * Hh * 4)                # f32 accumulator scratch

    for min_steps in (4, 2, 1):
        for bt in bt_cands:
            if B // bt < min_steps:
                continue
            for hk in hk_cands:
                fp = footprint(bt, hk)
                if fp <= budget_bytes:
                    return bt, hk, fp
    bt, hk = min(bt_cands), min(hk_cands)   # nothing fits: smallest legal blocks
    return bt, hk, footprint(bt, hk)


def tanh_attention(hidden, mask, w1_t, b1, w2, *,
                   compute_dtype=jnp.bfloat16, block_budget_bytes=None):
    """hidden: [B, S, H] f32; mask: [B, S] (nonzero = masked);
    w1_t: [H, Hh] (attn1.weight^T); b1: [Hh]; w2: [1, Hh] (attn2.weight).
    Returns softmax attention weights [B, S] (f32)."""
    B, S, H = hidden.shape
    Hh = w1_t.shape[1]

    # --- host-side preparation -------------------------------------------
    # Pad S to a multiple of 128: lane-dense mask/logits/out tiles and
    # layout-free reshapes in-kernel; padded positions are masked (-inf) so
    # they contribute 0 to the softmax.
    S_pad = ((S + 127) // 128) * 128

    hidden_c = hidden.astype(compute_dtype)     # bf16 halves the dominant DMA
    w1_c = w1_t.astype(compute_dtype)
    mask_i32 = mask.astype(jnp.int32)
    if S_pad != S:
        hidden_c = jnp.pad(hidden_c, ((0, 0), (0, S_pad - S), (0, 0)))
        mask_i32 = jnp.pad(mask_i32, ((0, 0), (0, S_pad - S)),
                           constant_values=1)
    b1_row = b1.reshape(1, Hh).astype(jnp.float32)
    w2_row = w2.reshape(1, Hh).astype(jnp.float32)

    # --- block / VMEM sizing ----------------------------------------------
    capacity = _vmem_capacity_bytes()
    if block_budget_bytes is None:
        # Leave double-buffer + compiler headroom; conservative on v7x (64 MiB).
        block_budget_bytes = min(capacity // 3, 24 * 1024 * 1024)

    itemsize = jnp.dtype(compute_dtype).itemsize
    bt, hk, fp = _pick_blocks(B, S_pad, H, Hh, itemsize, block_budget_bytes)
    n_b, n_k = B // bt, H // hk

    vmem_limit = int(min(capacity * 0.9,
                         max(2 * fp + (4 << 20), 32 << 20)))

    # --- pallas call --------------------------------------------------------
    out = pl.pallas_call(
        _tanh_attention_kernel,
        out_shape=jax.ShapeDtypeStruct((B, S_pad), jnp.float32),
        grid=(n_b, n_k),
        in_specs=[
            pl.BlockSpec((bt, S_pad, hk), lambda b, k: (b, 0, k)),
            pl.BlockSpec((bt, S_pad), lambda b, k: (b, 0)),
            pl.BlockSpec((hk, Hh), lambda b, k: (k, 0)),
            pl.BlockSpec((1, Hh), lambda b, k: (0, 0)),
            pl.BlockSpec((1, Hh), lambda b, k: (0, 0)),
        ],
        # Output block index constant along k => resident across the reduction.
        out_specs=pl.BlockSpec((bt, S_pad), lambda b, k: (b, 0)),
        scratch_shapes=[pltpu.VMEM((bt * S_pad, Hh), jnp.float32)],
        compiler_params=pltpu.CompilerParams(
            dimension_semantics=("parallel", "arbitrary"),
            vmem_limit_bytes=vmem_limit,
        ),
    )(hidden_c, mask_i32, w1_c, b1_row, w2_row)
    return out[:, :S]


def _reference(hidden, mask, w1_t, b1, w2):
    a1 = jnp.tanh(jnp.einsum("bsh,hk->bsk", hidden, w1_t) + b1)
    logits = jnp.einsum("bsk,k->bs", a1, w2.reshape(-1))
    logits = jnp.where(mask != 0, -jnp.inf, logits)
    return jax.nn.softmax(logits, axis=-1)


if __name__ == "__main__":
    def make_inputs(key, B, S, H):
        Hh = H // 2
        k_h, k_m, k_w1, k_w2 = jax.random.split(key, 4)
        hidden = jax.random.normal(k_h, (B, S, H), dtype=jnp.float32)
        # mask: nonzero => masked; keep >=1 unmasked position per row
        # (all-masked rows give NaN in both kernel and torch reference).
        mask = (jax.random.uniform(k_m, (B, S)) < 0.3).astype(jnp.int32)
        mask = mask.at[:, 0].set(0)
        # Deterministic parameter init mirroring the PyTorch __init__:
        stdv1 = 1.0 / math.sqrt(H)
        w1 = jax.random.uniform(k_w1, (Hh, H), minval=-stdv1, maxval=stdv1,
                                dtype=jnp.float32)          # attn1.weight
        b1 = jnp.zeros((Hh,), dtype=jnp.float32)            # attn1.bias = 0
        stdv2 = 1.0 / math.sqrt(Hh)
        w2 = jax.random.uniform(k_w2, (1, Hh), minval=-stdv2, maxval=stdv2,
                                dtype=jnp.float32)          # attn2.weight
        return hidden, mask, w1.T, b1, w2

    key = jax.random.PRNGKey(0)
    k1, k2 = jax.random.split(key)

    # 1) Small shape matching the module spec (B=2, S=8, H=32), bf16 compute
    #    (tolerance loosened to cover bf16 inputs + approx reciprocal).
    hidden, mask, w1_t, b1, w2 = make_inputs(k1, 2, 8, 32)
    out = tanh_attention(hidden, mask, w1_t, b1, w2)
    jax.block_until_ready(out)
    ref = _reference(hidden, mask, w1_t, b1, w2)
    assert out.shape == (2, 8)
    assert jnp.allclose(out, ref, atol=2e-2, rtol=2e-2)

    # 2) Same shape, f32 compute path (structure check without bf16 rounding).
    out32 = tanh_attention(hidden, mask, w1_t, b1, w2,
                           compute_dtype=jnp.float32)
    jax.block_until_ready(out32)
    assert jnp.allclose(out32, ref, atol=2e-2, rtol=2e-2)

    # 3) Exercise the H-reduction grid axis, S padding and multi-batch-block
    #    path by forcing a tiny block budget: B=16, S=12 (pads to 128), H=256
    #    -> Bt=8, Hk=128, grid=(2, 2).
    hidden3, mask3, w1_t3, b13, w23 = make_inputs(k2, 16, 12, 256)
    out3 = tanh_attention(hidden3, mask3, w1_t3, b13, w23,
                          block_budget_bytes=1_200_000)
    jax.block_until_ready(out3)
    ref3 = _reference(hidden3, mask3, w1_t3, b13, w23)
    assert out3.shape == (16, 12)
    assert jnp.allclose(out3, ref3, atol=2e-2, rtol=2e-2)

    print("KERNEL_OK")
</pallas_src>

<mosaic_0001>
module attributes {stable_mosaic.version = 11 : i64} {
  func.func @_tanh_attention_kernel(%arg0: i32, %arg1: i32, %arg2: memref<2x128x32xbf16, #tpu.memory_space<vmem>>, %arg3: memref<2x128xi32, #tpu.memory_space<vmem>>, %arg4: memref<32x16xbf16, #tpu.memory_space<vmem>>, %arg5: memref<1x16xf32, #tpu.memory_space<vmem>>, %arg6: memref<1x16xf32, #tpu.memory_space<vmem>>, %arg7: memref<2x128xf32, #tpu.memory_space<vmem>>, %arg8: memref<256x16xf32, #tpu.memory_space<vmem>>) attributes {dimension_semantics = [#tpu.dimension_semantics<parallel>, #tpu.dimension_semantics<arbitrary>], iteration_bounds = array<i64: 1, 1>, scalar_prefetch = 0 : i64, scratch_operands = 1 : i64, tpu.core_type = #tpu.core_type<tc>, window_params = [{transform_indices = @transform_0, window_bounds = array<i64: 2, 128, 32>}, {transform_indices = @transform_1, window_bounds = array<i64: 2, 128>}, {transform_indices = @transform_2, window_bounds = array<i64: 32, 16>}, {pipeline_mode = #tpu.pipeline_mode<synchronous>, transform_indices = @transform_3, window_bounds = array<i64: 1, 16>}, {pipeline_mode = #tpu.pipeline_mode<synchronous>, transform_indices = @transform_4, window_bounds = array<i64: 1, 16>}, {transform_indices = @transform_5, window_bounds = array<i64: 2, 128>}]} {
    %c0_i32 = arith.constant 0 : i32
    %0 = arith.cmpi eq, %arg1, %c0_i32 : i32
    %1 = arith.extui %0 : i1 to i32
    %c0_i32_0 = arith.constant 0 : i32
    %2 = arith.cmpi ne, %1, %c0_i32_0 : i32
    scf.if %2 {
      %cst_11 = arith.constant 0.000000e+00 : f32
      %13 = vector.broadcast %cst_11 : f32 to vector<256x16xf32>
      %c0_12 = arith.constant 0 : index
      %c0_13 = arith.constant 0 : index
      %14 = vector.load %arg8[%c0_12, %c0_13] : memref<256x16xf32, #tpu.memory_space<vmem>>, vector<256x16xf32>
      tpu.vector_store %arg8[%c0_12, %c0_13], %13 {strides = array<i32>} : memref<256x16xf32, #tpu.memory_space<vmem>>, vector<256x16xf32>,
    } else {
    }
    %c0 = arith.constant 0 : index
    %c0_1 = arith.constant 0 : index
    %c0_2 = arith.constant 0 : index
    %3 = vector.load %arg2[%c0, %c0_1, %c0_2] : memref<2x128x32xbf16, #tpu.memory_space<vmem>>, vector<2x128x32xbf16>
    %4 = vector.shape_cast %3 : vector<2x128x32xbf16> to vector<256x32xbf16>
    %c0_3 = arith.constant 0 : index
    %c0_4 = arith.constant 0 : index
    %5 = vector.load %arg8[%c0_3, %c0_4] : memref<256x16xf32, #tpu.memory_space<vmem>>, vector<256x16xf32>
    %c0_5 = arith.constant 0 : index
    %c0_6 = arith.constant 0 : index
    %6 = vector.load %arg4[%c0_5, %c0_6] : memref<32x16xbf16, #tpu.memory_space<vmem>>, vector<32x16xbf16>
    %cst = arith.constant dense<0.000000e+00> : vector<256x16xf32>
    %7 = tpu.matmul %4, %6, %cst {dimension_numbers = #tpu.dot_dimension_numbers<[1], [0], [0], [1], [0, 0, 1, 1], [], []>} : vector<256x32xbf16>, vector<32x16xbf16>, vector<256x16xf32> -> vector<256x16xf32>
    %8 = arith.addf %5, %7 : vector<256x16xf32>
    %c0_7 = arith.constant 0 : index
    %c0_8 = arith.constant 0 : index
    %9 = vector.load %arg8[%c0_7, %c0_8] : memref<256x16xf32, #tpu.memory_space<vmem>>, vector<256x16xf32>
    tpu.vector_store %arg8[%c0_7, %c0_8], %8 {strides = array<i32>} : memref<256x16xf32, #tpu.memory_space<vmem>>, vector<256x16xf32>,
    %c0_i32_9 = arith.constant 0 : i32
    %10 = arith.cmpi eq, %arg1, %c0_i32_9 : i32
    %11 = arith.extui %10 : i1 to i32
    %c0_i32_10 = arith.constant 0 : i32
    %12 = arith.cmpi ne, %11, %c0_i32_10 : i32
    scf.if %12 {
      %c0_11 = arith.constant 0 : index
      %c0_12 = arith.constant 0 : index
      %13 = vector.load %arg8[%c0_11, %c0_12] : memref<256x16xf32, #tpu.memory_space<vmem>>, vector<256x16xf32>
      %c0_13 = arith.constant 0 : index
      %c0_14 = arith.constant 0 : index
      %14 = vector.load %arg5[%c0_13, %c0_14] : memref<1x16xf32, #tpu.memory_space<vmem>>, vector<1x16xf32>
      %15 = vector.broadcast %14 : vector<1x16xf32> to vector<256x16xf32>
      %16 = arith.addf %13, %15 : vector<256x16xf32>
      %17 = math.tanh %16 : vector<256x16xf32>
      %c0_15 = arith.constant 0 : index
      %c0_16 = arith.constant 0 : index
      %18 = vector.load %arg6[%c0_15, %c0_16] : memref<1x16xf32, #tpu.memory_space<vmem>>, vector<1x16xf32>
      %19 = vector.broadcast %18 : vector<1x16xf32> to vector<256x16xf32>
      %20 = arith.mulf %17, %19 : vector<256x16xf32>
      %21 = vector.shape_cast %20 : vector<256x16xf32> to vector<2x128x16xf32>
      %cst_17 = arith.constant dense<0.000000e+00> : vector<2x128xf32>
      %22 = vector.multi_reduction <add>, %21, %cst_17 [2] : vector<2x128x16xf32> to vector<2x128xf32>
      %c0_18 = arith.constant 0 : index
      %c0_19 = arith.constant 0 : index
      %23 = vector.load %arg3[%c0_18, %c0_19] : memref<2x128xi32, #tpu.memory_space<vmem>>, vector<2x128xi32>
      %c0_i32_20 = arith.constant 0 : i32
      %24 = vector.broadcast %c0_i32_20 : i32 to vector<2x128xi32>
      %25 = arith.cmpi ne, %23, %24 : vector<2x128xi32>
      %cst_21 = arith.constant 0xFF800000 : f32
      %26 = vector.broadcast %cst_21 : f32 to vector<2x128xf32>
      %27 = arith.select %25, %26, %22 : vector<2x128xi1>, vector<2x128xf32>
      %cst_22 = arith.constant dense<0xFF800000> : vector<2xf32>
      %28 = vector.multi_reduction <maximumf>, %27, %cst_22 [1] : vector<2x128xf32> to vector<2xf32>
      %29 = vector.shape_cast %28 : vector<2xf32> to vector<2x1xf32>
      %30 = vector.broadcast %29 : vector<2x1xf32> to vector<2x128xf32>
      %31 = arith.subf %27, %30 : vector<2x128xf32>
      %32 = math.exp %31 : vector<2x128xf32>
      %cst_23 = arith.constant dense<0.000000e+00> : vector<2xf32>
      %33 = vector.multi_reduction <add>, %32, %cst_23 [1] : vector<2x128xf32> to vector<2xf32>
      %34 = vector.shape_cast %33 : vector<2xf32> to vector<2x1xf32>
      %35 = tpu.reciprocal %34 {approx = true} : vector<2x1xf32> -> vector<2x1xf32>
      %36 = vector.broadcast %35 : vector<2x1xf32> to vector<2x128xf32>
      %37 = arith.mulf %32, %36 : vector<2x128xf32>
      %c0_24 = arith.constant 0 : index
      %c0_25 = arith.constant 0 : index
      %38 = vector.load %arg7[%c0_24, %c0_25] : memref<2x128xf32, #tpu.memory_space<vmem>>, vector<2x128xf32>
      tpu.vector_store %arg7[%c0_24, %c0_25], %37 {strides = array<i32>} : memref<2x128xf32, #tpu.memory_space<vmem>>, vector<2x128xf32>,
    } else {
    }
    return
  }
  func.func @transform_0(%arg0: i32, %arg1: i32) -> (i32, i32, i32) {
    %c0_i32 = arith.constant 0 : i32
    %c0_i32_0 = arith.constant 0 : i32
    return %arg0, %c0_i32, %arg1 : i32, i32, i32
  }
  func.func @transform_1(%arg0: i32, %arg1: i32) -> (i32, i32) {
    %c0_i32 = arith.constant 0 : i32
    %c0_i32_0 = arith.constant 0 : i32
    return %arg0, %c0_i32 : i32, i32
  }
  func.func @transform_2(%arg0: i32, %arg1: i32) -> (i32, i32) {
    %c0_i32 = arith.constant 0 : i32
    %c0_i32_0 = arith.constant 0 : i32
    return %arg1, %c0_i32 : i32, i32
  }
  func.func @transform_3(%arg0: i32, %arg1: i32) -> (i32, i32) {
    %c0_i32 = arith.constant 0 : i32
    %c0_i32_0 = arith.constant 0 : i32
    %c0_i32_1 = arith.constant 0 : i32
    return %c0_i32, %c0_i32_0 : i32, i32
  }
  func.func @transform_4(%arg0: i32, %arg1: i32) -> (i32, i32) {
    %c0_i32 = arith.constant 0 : i32
    %c0_i32_0 = arith.constant 0 : i32
    %c0_i32_1 = arith.constant 0 : i32
    return %c0_i32, %c0_i32_0 : i32, i32
  }
  func.func @transform_5(%arg0: i32, %arg1: i32) -> (i32, i32) {
    %c0_i32 = arith.constant 0 : i32
    %c0_i32_0 = arith.constant 0 : i32
    return %arg0, %c0_i32 : i32, i32
  }
}

</mosaic_0001>

<bundles_post_ra>
// kernel: tpu_custom_call.1
= control target key start
LH: loop header
LB: loop body
LE: loop exit
PB: predicated region body
PF: predicated region fallthrough
CT: control target
= control target key end

     0   :  { %vm219_vm0 = vcmask 261120   ;;  %vm26_vm1 = vcmask 130048   ;;  %v1194_v4 = vmov 0.0   ;;  %s1544_s0 = inlined_call_operand.vmem [shape: bf16[2,128,32], index: 0, kind: input, shape index: {}]   ;;  %s1545_s1 = inlined_call_operand.vmem [shape: s32[2,128], index: 1, kind: input, shape index: {}]   ;;  %s1546_s2 = inlined_call_operand.vmem [shape: bf16[32,16], index: 2, kind: input, shape index: {}]   ;;  %s1547_s3 = inlined_call_operand.vmem [shape: f32[1,16], index: 3, kind: input, shape index: {}]   ;;  %s1548_s4 = inlined_call_operand.vmem [shape: f32[1,16], index: 4, kind: input, shape index: {}]   ;;  %s1549_s5 = inlined_call_operand.hbm [shape: f32[2,128], index: 5, kind: output, shape index: {}]  }
   0x1   :  { %v1086_v0 = vld [vmem:[%s1546_s2 + $0x8] sm:$0xff]   ;;  %v1087_v1 = vld [vmem:[%s1546_s2] sm:$0xff]   ;;  %29 = vst.msk [vmem:[#allocation2 + $0x10] sm:$0xff] %vm26_vm1, %v1194_v4  ;;  %27 = vst.msk [vmem:[#allocation2] sm:$0xff] %vm26_vm1, %v1194_v4 }
   0x2   :  { %1044 = vmatprep.subr.bf16.mxu0 %v1086_v0  ;;  %1080 = vmatprep.subr.bf16.mxu1 %v1086_v0  ;;  %v1088_v2 = vld [vmem:[%s1544_s0] sm:$0xff]   ;;  %28 = vst.msk [vmem:[#allocation2 + $0x8] sm:$0xff] %vm26_vm1, %v1194_v4  ;;  %30 = vst.msk [vmem:[#allocation2 + $0x18] sm:$0xff] %vm26_vm1, %v1194_v4  ;;  %v1090_v5 = vld [vmem:[%s1544_s0 + $0x8] sm:$0xff]  }
   0x3   :  { %1045 = vmatpush3.bf16.msra.mxu0 %v1086_v0  ;;  %1082 = vmatpush3.bf16.msra.mxu1 %v1086_v0  ;;  %v1089_v3 = vld [vmem:[%s1544_s0 + $0x40] sm:$0xff]   ;;  %31 = vst.msk [vmem:[#allocation2 + $0x20] sm:$0xff] %vm26_vm1, %v1194_v4  ;;  %32 = vst.msk [vmem:[#allocation2 + $0x28] sm:$0xff] %vm26_vm1, %v1194_v4  ;;  %v1091_v6 = vld [vmem:[%s1544_s0 + $0x48] sm:$0xff]  }
   0x4   :  { %33 = vst.msk [vmem:[#allocation2 + $0x30] sm:$0xff] %vm26_vm1, %v1194_v4  ;;  %34 = vst.msk [vmem:[#allocation2 + $0x38] sm:$0xff] %vm26_vm1, %v1194_v4  ;;  %1046 = vmatprep.subr.bf16.mxu0 %v1087_v1  ;;  %1081 = vmatprep.subr.bf16.mxu1 %v1087_v1  ;;  %v1092_v7 = vld [vmem:[%s1544_s0 + $0x10] sm:$0xff]   ;;  %v1094_v9 = vld [vmem:[%s1544_s0 + $0x18] sm:$0xff]  }
   0x5   :  { %35 = vst.msk [vmem:[#allocation2 + $0x40] sm:$0xff] %vm26_vm1, %v1194_v4  ;;  %36 = vst.msk [vmem:[#allocation2 + $0x48] sm:$0xff] %vm26_vm1, %v1194_v4  ;;  %1048 = vmatprep.mubr.msk.bf16.mxu0 %vm219_vm0, %v1088_v2  ;;  %1064 = vmatprep.mubr.msk.bf16.mxu1 %vm219_vm0, %v1089_v3  ;;  %v1093_v8 = vld [vmem:[%s1544_s0 + $0x50] sm:$0xff]   ;;  %v1095_v10 = vld [vmem:[%s1544_s0 + $0x58] sm:$0xff]  }
   0x6   :  { %37 = vst.msk [vmem:[#allocation2 + $0x50] sm:$0xff] %vm26_vm1, %v1194_v4  ;;  %38 = vst.msk [vmem:[#allocation2 + $0x58] sm:$0xff] %vm26_vm1, %v1194_v4  ;;  %v1096_v11 = vld [vmem:[%s1544_s0 + $0x20] sm:$0xff]  }
   0x7   :  { %39 = vst.msk [vmem:[#allocation2 + $0x60] sm:$0xff] %vm26_vm1, %v1194_v4  ;;  %40 = vst.msk [vmem:[#allocation2 + $0x68] sm:$0xff] %vm26_vm1, %v1194_v4  ;;  %1047 = vmatpush3.bf16.msra.mxu0 %v1087_v1  ;;  %1083 = vmatpush3.bf16.msra.mxu1 %v1087_v1  ;;  %v1097_v12 = vld [vmem:[%s1544_s0 + $0x60] sm:$0xff]  }
   0x8   :  { %41 = vst.msk [vmem:[#allocation2 + $0x70] sm:$0xff] %vm26_vm1, %v1194_v4  ;;  %42 = vst.msk [vmem:[#allocation2 + $0x78] sm:$0xff] %vm26_vm1, %v1194_v4 }
   0x9   :  { %43 = vst.msk [vmem:[#allocation2 + $0x80] sm:$0xff] %vm26_vm1, %v1194_v4  ;;  %44 = vst.msk [vmem:[#allocation2 + $0x88] sm:$0xff] %vm26_vm1, %v1194_v4 }
   0xa   :  { %45 = vst.msk [vmem:[#allocation2 + $0x90] sm:$0xff] %vm26_vm1, %v1194_v4  ;;  %46 = vst.msk [vmem:[#allocation2 + $0x98] sm:$0xff] %vm26_vm1, %v1194_v4  ;;  %1049 = vmatmul.mubr.msk.bf16.vlgmr.msra.gmra.mxu0 %vm219_vm0, %v1090_v5  ;;  %1065 = vmatmul.mubr.msk.bf16.vlgmr.msra.gmra.mxu1 %vm219_vm0, %v1091_v6 }
   0xb   :  { %47 = vst.msk [vmem:[#allocation2 + $0xa0] sm:$0xff] %vm26_vm1, %v1194_v4  ;;  %48 = vst.msk [vmem:[#allocation2 + $0xa8] sm:$0xff] %vm26_vm1, %v1194_v4  ;;  %1052 = vmatprep.mubr.msk.bf16.mxu0 %vm219_vm0, %v1092_v7  ;;  %1068 = vmatprep.mubr.msk.bf16.mxu1 %vm219_vm0, %v1093_v8 }
   0xc   :  { %49 = vst.msk [vmem:[#allocation2 + $0xb0] sm:$0xff] %vm26_vm1, %v1194_v4  ;;  %50 = vst.msk [vmem:[#allocation2 + $0xb8] sm:$0xff] %vm26_vm1, %v1194_v4 }
   0xd   :  { %51 = vst.msk [vmem:[#allocation2 + $0xc0] sm:$0xff] %vm26_vm1, %v1194_v4  ;;  %52 = vst.msk [vmem:[#allocation2 + $0xc8] sm:$0xff] %vm26_vm1, %v1194_v4 }
   0xe   :  { %53 = vst.msk [vmem:[#allocation2 + $0xd0] sm:$0xff] %vm26_vm1, %v1194_v4  ;;  %54 = vst.msk [vmem:[#allocation2 + $0xd8] sm:$0xff] %vm26_vm1, %v1194_v4 }
   0xf   :  { %55 = vst.msk [vmem:[#allocation2 + $0xe0] sm:$0xff] %vm26_vm1, %v1194_v4  ;;  %56 = vst.msk [vmem:[#allocation2 + $0xe8] sm:$0xff] %vm26_vm1, %v1194_v4 }
  0x10   :  { %57 = vst.msk [vmem:[#allocation2 + $0xf0] sm:$0xff] %vm26_vm1, %v1194_v4  ;;  %58 = vst.msk [vmem:[#allocation2 + $0xf8] sm:$0xff] %vm26_vm1, %v1194_v4 }
  0x12   :  { %1053 = vmatmul.mubr.msk.bf16.gmra.mxu0 %vm219_vm0, %v1094_v9  ;;  %1069 = vmatmul.mubr.msk.bf16.gmra.mxu1 %vm219_vm0, %v1095_v10 }
  0x13   :  { %10 = vsyncpa [#allocation4], 0  ;;  %1056 = vmatprep.mubr.msk.bf16.mxu0 %vm219_vm0, %v1096_v11  ;;  %1072 = vmatprep.mubr.msk.bf16.mxu1 %vm219_vm0, %v1097_v12  ;;  %v1098_v13 = vld [vmem:[%s1544_s0 + $0x28] sm:$0xff]   ;;  %v1100_v15 = vld [vmem:[%s1544_s0 + $0x30] sm:$0xff]   ;;  %vm780_vm2 = vcmask 130112   ;;  %vm787_vm3 = vcmask 195712  }
  0x14   :  { %v1099_v14 = vld [vmem:[%s1544_s0 + $0x68] sm:$0xff]   ;;  %v1101_v16 = vld [vmem:[%s1544_s0 + $0x70] sm:$0xff]   ;;  %v1102_v17 = vld [vmem:[%s1544_s0 + $0x38] sm:$0xff]   ;;  %vm794_vm4 = vcmask 261312   ;;  %vm801_vm5 = vcmask 326912   ;;  %vm808_vm6 = vcmask 392512  }
  0x15   :  { %v1103_v18 = vld [vmem:[%s1544_s0 + $0x78] sm:$0xff]   ;;  %v93_v19 = vld [vmem:[#allocation2 + $0x10] sm:$0xff]  ;;  %v91_v23 = vld [vmem:[#allocation2] sm:$0xff]  ;;  %vm815_vm7 = vcmask 458112   ;;  %vm822_vm8 = vcmask 523712   ;;  %vm829_vm9 = vcmask 589312  }
  0x16   :  { %v109_v20 = vld [vmem:[#allocation2 + $0x90] sm:$0xff]  ;;  %v107_v24 = vld [vmem:[#allocation2 + $0x80] sm:$0xff]  ;;  %v94_v29 = vld [vmem:[#allocation2 + $0x18] sm:$0xff]  ;;  %vm836_vm10 = vcmask 654912   ;;  %vm843_vm11 = vcmask 720512   ;;  %vm850_vm12 = vcmask 786112  }
  0x17   :  { %v110_v30 = vld [vmem:[#allocation2 + $0x98] sm:$0xff]  ;;  %v92_v35 = vld [vmem:[#allocation2 + $0x8] sm:$0xff]  ;;  %v97_v41 = vld [vmem:[#allocation2 + $0x30] sm:$0xff]  ;;  %vm857_vm13 = vcmask 851712   ;;  %vm864_vm14 = vcmask 917312   ;;  %vm871_vm15 = vcmask 982912  }
  0x18   :  { %v108_v36 = vld [vmem:[#allocation2 + $0x88] sm:$0xff]  ;;  %v113_v42 = vld [vmem:[#allocation2 + $0xb0] sm:$0xff]  ;;  %v95_v47 = vld [vmem:[#allocation2 + $0x20] sm:$0xff] }
  0x19   :  { %v111_v48 = vld [vmem:[#allocation2 + $0xa0] sm:$0xff]  ;;  %v98_v52 = vld [vmem:[#allocation2 + $0x38] sm:$0xff]  ;;  %v96_v60 = vld [vmem:[#allocation2 + $0x28] sm:$0xff] }
  0x1a   :  { %1057 = vmatmul.mubr.msk.bf16.gmra.mxu0 %vm219_vm0, %v1098_v13  ;;  %1073 = vmatmul.mubr.msk.bf16.gmra.mxu1 %vm219_vm0, %v1099_v14  ;;  %v1337_v49 = vld [vmem:[%s1547_s3] ss:$0 sm:$0xff]  ;;  %v114_v55 = vld [vmem:[#allocation2 + $0xb8] sm:$0xff]  ;;  %v112_v1 = vld [vmem:[#allocation2 + $0xa8] sm:$0xff] }
  0x1b   :  { %1060 = vmatprep.mubr.msk.bf16.mxu0 %vm219_vm0, %v1100_v15  ;;  %1076 = vmatprep.mubr.msk.bf16.mxu1 %vm219_vm0, %v1101_v16  ;;  %v101_v6 = vld [vmem:[#allocation2 + $0x50] sm:$0xff]  ;;  %v99_v16 = vld [vmem:[#allocation2 + $0x40] sm:$0xff] }
  0x1c   :  { %v117_v10 = vld [vmem:[#allocation2 + $0xd0] sm:$0xff] }
  0x22   :  { %1061 = vmatmul.mubr.msk.bf16.gmra.mxu0 %vm219_vm0, %v1102_v17  ;;  %1077 = vmatmul.mubr.msk.bf16.gmra.mxu1 %vm219_vm0, %v1103_v18  ;;  %vm878_vm0 = vcmask 1048512  }
  0xca   :  { %v1050_v21 = vpop.f32.mrf.mxu0  ;;  %v1066_v22 = vpop.f32.mrf.mxu1 }
  0xcb   :  { %v431_v25 = vadd.f32 %v1050_v21, %v93_v19  ;;  %v447_v26 = vadd.f32 %v1066_v22, %v109_v20  ;;  %v115_v20 = vld [vmem:[#allocation2 + $0xc0] sm:$0xff] }
  0xcc   :  { %v302_v27 = vpop.f32.mrf.mxu0  ;;  %v366_v28 = vpop.f32.mrf.mxu1 }
  0xcd   :  { %464 = vst.msk [vmem:[#allocation2 + $0x10] sm:$0xff] %vm26_vm1, %v431_v25  ;;  %480 = vst.msk [vmem:[#allocation2 + $0x90] sm:$0xff] %vm26_vm1, %v447_v26  ;;  %v429_v31 = vadd.f32 %v302_v27, %v91_v23  ;;  %v445_v32 = vadd.f32 %v366_v28, %v107_v24  ;;  %v102_v26 = vld [vmem:[#allocation2 + $0x58] sm:$0xff] }
  0xce   :  { %v1051_v33 = vpop.f32.mrf.mxu0  ;;  %v1067_v34 = vpop.f32.mrf.mxu1 }
  0xcf   :  { %462 = vst.msk [vmem:[#allocation2] sm:$0xff] %vm26_vm1, %v429_v31  ;;  %478 = vst.msk [vmem:[#allocation2 + $0x80] sm:$0xff] %vm26_vm1, %v445_v32  ;;  %v432_v37 = vadd.f32 %v1051_v33, %v94_v29  ;;  %v448_v38 = vadd.f32 %v1067_v34, %v110_v30  ;;  %v118_v30 = vld [vmem:[#allocation2 + $0xd8] sm:$0xff] }
  0xd0   :  { %v305_v39 = vpop.f32.mrf.mxu0  ;;  %v369_v40 = vpop.f32.mrf.mxu1 }
  0xd1   :  { %465 = vst.msk [vmem:[#allocation2 + $0x18] sm:$0xff] %vm26_vm1, %v432_v37  ;;  %481 = vst.msk [vmem:[#allocation2 + $0x98] sm:$0xff] %vm26_vm1, %v448_v38  ;;  %v430_v43 = vadd.f32 %v305_v39, %v92_v35  ;;  %v446_v44 = vadd.f32 %v369_v40, %v108_v36  ;;  %v100_v39 = vld [vmem:[#allocation2 + $0x48] sm:$0xff] }
  0xd2   :  { %v1054_v45 = vpop.f32.mrf.mxu0  ;;  %v1070_v46 = vpop.f32.mrf.mxu1  ;;  %v116_v40 = vld [vmem:[#allocation2 + $0xc8] sm:$0xff] }
  0xd3   :  { %463 = vst.msk [vmem:[#allocation2 + $0x8] sm:$0xff] %vm26_vm1, %v430_v43  ;;  %479 = vst.msk [vmem:[#allocation2 + $0x88] sm:$0xff] %vm26_vm1, %v446_v44  ;;  %v435_v50 = vadd.f32 %v1054_v45, %v97_v41  ;;  %v451_v51 = vadd.f32 %v1070_v46, %v113_v42 }
  0xd4   :  { %v318_v53 = vpop.f32.mrf.mxu0  ;;  %v382_v54 = vpop.f32.mrf.mxu1  ;;  %v515_v56 = vld [vmem:[#allocation2 + $0x90] sm:$0xff] }
  0xd5   :  { %v499_v57 = vld [vmem:[#allocation2 + $0x10] sm:$0xff]  ;;  %468 = vst.msk [vmem:[#allocation2 + $0x30] sm:$0xff] %vm26_vm1, %v435_v50  ;;  %484 = vst.msk [vmem:[#allocation2 + $0xb0] sm:$0xff] %vm26_vm1, %v451_v51  ;;  %v433_v58 = vadd.f32 %v318_v53, %v95_v47  ;;  %v449_v59 = vadd.f32 %v382_v54, %v111_v48  ;;  %v554_v61 = vadd.f32 %v1337_v49, %v515_v56  ;;  %v1368_v53 = vld [vmem:[%s1548_s4] ss:$0 sm:$0xff] }
  0xd6   :  { %v538_v62 = vadd.f32 %v1337_v49, %v499_v57  ;;  %v1055_v63 = vpop.f32.mrf.mxu0  ;;  %v1071_v0 = vpop.f32.mrf.mxu1  ;;  %v513_v2 = vld [vmem:[#allocation2 + $0x80] sm:$0xff]  ;;  %v105_v47 = vld [vmem:[#allocation2 + $0x70] sm:$0xff] }
  0xd7   :  { %v497_v3 = vld [vmem:[#allocation2] sm:$0xff]  ;;  %466 = vst.msk [vmem:[#allocation2 + $0x20] sm:$0xff] %vm26_vm1, %v433_v58  ;;  %482 = vst.msk [vmem:[#allocation2 + $0xa0] sm:$0xff] %vm26_vm1, %v449_v59  ;;  %v436_v4 = vadd.f32 %v1055_v63, %v98_v52  ;;  %v452_v5 = vadd.f32 %v1071_v0, %v114_v55  ;;  %1104 = vtanh.f32 %v554_v61  ;;  %v552_v7 = vadd.f32 %v1337_v49, %v513_v2  ;;  %v121_v48 = vld [vmem:[#allocation2 + $0xf0] sm:$0xff] }
  0xd8   :  { %v321_v8 = vpop.f32.mrf.mxu0  ;;  %v385_v9 = vpop.f32.mrf.mxu1  ;;  %1106 = vtanh.f32 %v538_v62  ;;  %v536_v11 = vadd.f32 %v1337_v49, %v497_v3  ;;  %v516_v12 = vld [vmem:[#allocation2 + $0x98] sm:$0xff]  ;;  %v103_v56 = vld [vmem:[#allocation2 + $0x60] sm:$0xff] }
  0xd9   :  { %v500_v13 = vld [vmem:[#allocation2 + $0x18] sm:$0xff]  ;;  %469 = vst.msk [vmem:[#allocation2 + $0x38] sm:$0xff] %vm26_vm1, %v436_v4  ;;  %485 = vst.msk [vmem:[#allocation2 + $0xb8] sm:$0xff] %vm26_vm1, %v452_v5  ;;  %v434_v14 = vadd.f32 %v321_v8, %v96_v60  ;;  %v450_v15 = vadd.f32 %v385_v9, %v112_v1  ;;  %1108 = vtanh.f32 %v552_v7  ;;  %v555_v17 = vadd.f32 %v1337_v49, %v516_v12  ;;  %v119_v57 = vld [vmem:[#allocation2 + $0xe0] sm:$0xff] }
  0xda   :  { %v1058_v18 = vpop.f32.mrf.mxu0  ;;  %v1074_v19 = vpop.f32.mrf.mxu1  ;;  %1110 = vtanh.f32 %v536_v11  ;;  %v539_v21 = vadd.f32 %v1337_v49, %v500_v13  ;;  %v514_v22 = vld [vmem:[#allocation2 + $0x88] sm:$0xff]  ;;  %v106_v1 = vld [vmem:[#allocation2 + $0x78] sm:$0xff] }
  0xdb   :  { %v498_v23 = vld [vmem:[#allocation2 + $0x8] sm:$0xff]  ;;  %467 = vst.msk [vmem:[#allocation2 + $0x28] sm:$0xff] %vm26_vm1, %v434_v14  ;;  %483 = vst.msk [vmem:[#allocation2 + $0xa8] sm:$0xff] %vm26_vm1, %v450_v15  ;;  %v439_v24 = vadd.f32 %v1058_v18, %v101_v6  ;;  %v455_v25 = vadd.f32 %v1074_v19, %v117_v10  ;;  %1112 = vtanh.f32 %v555_v17  ;;  %v553_v27 = vadd.f32 %v1337_v49, %v514_v22  ;;  %v122_v2 = vld [vmem:[#allocation2 + $0xf8] sm:$0xff] }
  0xdc   :  { %v334_v28 = vpop.f32.mrf.mxu0  ;;  %v398_v29 = vpop.f32.mrf.mxu1  ;;  %1114 = vtanh.f32 %v539_v21  ;;  %v537_v31 = vadd.f32 %v1337_v49, %v498_v23  ;;  %v519_v32 = vld [vmem:[#allocation2 + $0xb0] sm:$0xff]  ;;  %v104_v13 = vld [vmem:[#allocation2 + $0x68] sm:$0xff] }
  0xdd   :  { %v503_v33 = vld [vmem:[#allocation2 + $0x30] sm:$0xff]  ;;  %472 = vst.msk [vmem:[#allocation2 + $0x50] sm:$0xff] %vm26_vm1, %v439_v24  ;;  %488 = vst.msk [vmem:[#allocation2 + $0xd0] sm:$0xff] %vm26_vm1, %v455_v25  ;;  %v437_v34 = vadd.f32 %v334_v28, %v99_v16  ;;  %v453_v35 = vadd.f32 %v398_v29, %v115_v20  ;;  %v558_v36 = vadd.f32 %v1337_v49, %v519_v32  ;;  %1116 = vtanh.f32 %v553_v27  ;;  %v120_v14 = vld [vmem:[#allocation2 + $0xe8] sm:$0xff] }
  0xde   :  { %v1059_v37 = vpop.f32.mrf.mxu0  ;;  %v1075_v38 = vpop.f32.mrf.mxu1  ;;  %v542_v41 = vadd.f32 %v1337_v49, %v503_v33  ;;  %v517_v44 = vld [vmem:[#allocation2 + $0xa0] sm:$0xff]  ;;  %1118 = vtanh.f32 %v537_v31 }
  0xdf   :  { %470 = vst.msk [vmem:[#allocation2 + $0x40] sm:$0xff] %vm26_vm1, %v437_v34  ;;  %486 = vst.msk [vmem:[#allocation2 + $0xc0] sm:$0xff] %vm26_vm1, %v453_v35  ;;  %v440_v42 = vadd.f32 %v1059_v37, %v102_v26  ;;  %v456_v43 = vadd.f32 %v1075_v38, %v118_v30  ;;  %1120 = vtanh.f32 %v558_v36  ;;  %v501_v52 = vld [vmem:[#allocation2 + $0x20] sm:$0xff]  ;;  %v556_v58 = vadd.f32 %v1337_v49, %v517_v44 }
  0xe0   :  { %v337_v45 = vpop.f32.mrf.mxu0  ;;  %v401_v46 = vpop.f32.mrf.mxu1  ;;  %1122 = vtanh.f32 %v542_v41  ;;  %v520_v61 = vld [vmem:[#allocation2 + $0xb8] sm:$0xff]  ;;  %v540_v3 = vadd.f32 %v1337_v49, %v501_v52 }
  0xe1   :  { %473 = vst.msk [vmem:[#allocation2 + $0x58] sm:$0xff] %vm26_vm1, %v440_v42  ;;  %489 = vst.msk [vmem:[#allocation2 + $0xd8] sm:$0xff] %vm26_vm1, %v456_v43  ;;  %v438_v50 = vadd.f32 %v337_v45, %v100_v39  ;;  %v454_v51 = vadd.f32 %v401_v46, %v116_v40  ;;  %v504_v8 = vld [vmem:[#allocation2 + $0x38] sm:$0xff]  ;;  %1124 = vtanh.f32 %v556_v58  ;;  %v559_v15 = vadd.f32 %v1337_v49, %v520_v61 }
  0xe2   :  { %v1062_v54 = vpop.f32.mrf.mxu0  ;;  %v1078_v55 = vpop.f32.mrf.mxu1  ;;  %1126 = vtanh.f32 %v540_v3  ;;  %v543_v26 = vadd.f32 %v1337_v49, %v504_v8  ;;  %v518_v27 = vld [vmem:[#allocation2 + $0xa8] sm:$0xff] }
  0xe3   :  { %471 = vst.msk [vmem:[#allocation2 + $0x48] sm:$0xff] %vm26_vm1, %v438_v50  ;;  %487 = vst.msk [vmem:[#allocation2 + $0xc8] sm:$0xff] %vm26_vm1, %v454_v51  ;;  %v443_v59 = vadd.f32 %v1062_v54, %v105_v47  ;;  %v459_v60 = vadd.f32 %v1078_v55, %v121_v48  ;;  %v502_v31 = vld [vmem:[#allocation2 + $0x28] sm:$0xff]  ;;  %1128 = vtanh.f32 %v559_v15  ;;  %v557_v35 = vadd.f32 %v1337_v49, %v518_v27 }
  0xe4   :  { %v1105_v62 = vpop.eup %1104  ;;  %v350_v63 = vpop.f32.mrf.mxu0  ;;  %v523_v32 = vld [vmem:[#allocation2 + $0xd0] sm:$0xff]  ;;  %1130 = vtanh.f32 %v543_v26  ;;  %v541_v40 = vadd.f32 %v1337_v49, %v502_v31 }
  0xe5   :  { %v414_v0 = vpop.f32.mrf.mxu1  ;;  %v1107_v4 = vpop.eup %1106  ;;  %v625_v5 = vmul.f32 %v1105_v62, %v1368_v53  ;;  %476 = vst.msk [vmem:[#allocation2 + $0x70] sm:$0xff] %vm26_vm1, %v443_v59  ;;  %492 = vst.msk [vmem:[#allocation2 + $0xf0] sm:$0xff] %vm26_vm1, %v459_v60  ;;  %v441_v6 = vadd.f32 %v350_v63, %v103_v56  ;;  %v507_v36 = vld [vmem:[#allocation2 + $0x50] sm:$0xff]  ;;  %v562_v42 = vadd.f32 %v1337_v49, %v523_v32  ;;  %1132 = vtanh.f32 %v557_v35 }
  0xe6   :  { %v457_v7 = vadd.f32 %v414_v0, %v119_v57  ;;  %v1109_v9 = vpop.eup %1108  ;;  %v609_v10 = vmul.f32 %v1107_v4, %v1368_v53  ;;  %v1063_v11 = vpop.f32.mrf.mxu0  ;;  %v546_v44 = vadd.f32 %v1337_v49, %v507_v36  ;;  %1134 = vtanh.f32 %v541_v40  ;;  %v521_v51 = vld [vmem:[#allocation2 + $0xc0] sm:$0xff] }
  0xe7   :  { %v1079_v12 = vpop.f32.mrf.mxu1  ;;  %v1111_v16 = vpop.eup %1110  ;;  %v693_v17 = vsel %vm26_vm1, %v625_v5, 0.0  ;;  %v623_v18 = vmul.f32 %v1109_v9, %v1368_v53  ;;  %474 = vst.msk [vmem:[#allocation2 + $0x60] sm:$0xff] %vm26_vm1, %v441_v6  ;;  %v444_v19 = vadd.f32 %v1063_v11, %v106_v1  ;;  %1136 = vtanh.f32 %v562_v42  ;;  %v505_v54 = vld [vmem:[#allocation2 + $0x40] sm:$0xff] }
  0xe8   :  { %490 = vst.msk [vmem:[#allocation2 + $0xe0] sm:$0xff] %vm26_vm1, %v457_v7  ;;  %v460_v20 = vadd.f32 %v1079_v12, %v122_v2  ;;  %v1113_v21 = vpop.eup %1112  ;;  %694 = vadd.xlane.f32.xlu1 %v693_v17  ;;  %v645_v22 = vsel %vm26_vm1, %v609_v10, 0.0  ;;  %v607_v23 = vmul.f32 %v1111_v16, %v1368_v53  ;;  %v353_v24 = vpop.f32.mrf.mxu0  ;;  %1138 = vtanh.f32 %v546_v44  ;;  %v524_v61 = vld [vmem:[#allocation2 + $0xd8] sm:$0xff] }
  0xe9   :  { %v417_v25 = vpop.f32.mrf.mxu1  ;;  %v1115_v28 = vpop.eup %1114  ;;  %646 = vadd.xlane.f32.xlu0 %v645_v22  ;;  %477 = vst.msk [vmem:[#allocation2 + $0x78] sm:$0xff] %vm26_vm1, %v444_v19  ;;  %v442_v29 = vadd.f32 %v353_v24, %v104_v13  ;;  %v687_v33 = vsel %vm26_vm1, %v623_v18, 0.0  ;;  %v626_v34 = vmul.f32 %v1113_v21, %v1368_v53  ;;  %v560_v58 = vadd.f32 %v1337_v49, %v521_v51  ;;  %v508_v0 = vld [vmem:[#allocation2 + $0x58] sm:$0xff] }
  0xea   :  { %493 = vst.msk [vmem:[#allocation2 + $0xf8] sm:$0xff] %vm26_vm1, %v460_v20  ;;  %v458_v30 = vadd.f32 %v417_v25, %v120_v14  ;;  %v1117_v37 = vpop.eup %1116  ;;  %v639_v38 = vsel %vm26_vm1, %v607_v23, 0.0  ;;  %v610_v39 = vmul.f32 %v1115_v28, %v1368_v53  ;;  %v544_v60 = vadd.f32 %v1337_v49, %v505_v54  ;;  %v522_v7 = vld [vmem:[#allocation2 + $0xc8] sm:$0xff] }
  0xeb   :  { %475 = vst.msk [vmem:[#allocation2 + $0x68] sm:$0xff] %vm26_vm1, %v442_v29  ;;  %v1119_v41 = vpop.eup %1118  ;;  %v696_v46 = vsel %vm26_vm1, %v626_v34, 0.0  ;;  %v624_v47 = vmul.f32 %v1117_v37, %v1368_v53  ;;  %1140 = vtanh.f32 %v560_v58  ;;  %v563_v3 = vadd.f32 %v1337_v49, %v524_v61  ;;  %v506_v9 = vld [vmem:[#allocation2 + $0x48] sm:$0xff] }
  0xec   :  { %491 = vst.msk [vmem:[#allocation2 + $0xe8] sm:$0xff] %vm26_vm1, %v458_v30  ;;  %688 = vadd.xlane.f32.xlu1 %v687_v33  ;;  %v1121_v43 = vpop.eup %1120  ;;  %v648_v48 = vsel %vm26_vm1, %v610_v39, 0.0  ;;  %v608_v50 = vmul.f32 %v1119_v41, %v1368_v53  ;;  %1142 = vtanh.f32 %v544_v60  ;;  %v547_v6 = vadd.f32 %v1337_v49, %v508_v0  ;;  %v527_v10 = vld [vmem:[#allocation2 + $0xf0] sm:$0xff] }
  0xed   :  { %640 = vadd.xlane.f32.xlu0 %v639_v38  ;;  %v1123_v45 = vpop.eup %1122  ;;  %v629_v52 = vmul.f32 %v1121_v43, %v1368_v53  ;;  %v690_v57 = vsel %vm26_vm1, %v624_v47, 0.0  ;;  %1144 = vtanh.f32 %v563_v3  ;;  %v561_v13 = vadd.f32 %v1337_v49, %v522_v7  ;;  %v511_v14 = vld [vmem:[#allocation2 + $0x70] sm:$0xff] }
  0xee   :  { %v613_v55 = vmul.f32 %v1123_v45, %v1368_v53  ;;  %v1125_v56 = vpop.eup %1124  ;;  %v642_v59 = vsel %vm26_vm1, %v608_v50, 0.0  ;;  %1146 = vtanh.f32 %v547_v6  ;;  %v545_v18 = vadd.f32 %v1337_v49, %v506_v9  ;;  %v509_v30 = vld [vmem:[#allocation2 + $0x60] sm:$0xff] }
  0xef   :  { %v1127_v62 = vpop.eup %1126  ;;  %v705_v63 = vsel %vm26_vm1, %v629_v52, 0.0  ;;  %v627_v2 = vmul.f32 %v1125_v56, %v1368_v53  ;;  %v566_v20 = vadd.f32 %v1337_v49, %v527_v10  ;;  %v550_v22 = vadd.f32 %v1337_v49, %v511_v14  ;;  %v525_v28 = vld [vmem:[#allocation2 + $0xe0] sm:$0xff] }
  0xf0   :  { %697 = vadd.xlane.f32.xlu1 %v696_v46  ;;  %v657_v1 = vsel %vm26_vm1, %v613_v55, 0.0  ;;  %v1129_v4 = vpop.eup %1128  ;;  %v611_v5 = vmul.f32 %v1127_v62, %v1368_v53  ;;  %1148 = vtanh.f32 %v561_v13  ;;  %v564_v33 = vadd.f32 %v1337_v49, %v525_v28  ;;  %v512_v50 = vld [vmem:[#allocation2 + $0x78] sm:$0xff] }
  0xf1   :  { %649 = vadd.xlane.f32.xlu0 %v648_v48  ;;  %v1131_v8 = vpop.eup %1130  ;;  %v699_v11 = vsel %vm26_vm1, %v627_v2, 0.0  ;;  %v630_v12 = vmul.f32 %v1129_v4, %v1368_v53  ;;  %1150 = vtanh.f32 %v545_v18  ;;  %v548_v36 = vadd.f32 %v1337_v49, %v509_v30  ;;  %v528_v47 = vld [vmem:[#allocation2 + $0xf8] sm:$0xff] }
  0xf2   :  { %v1133_v15 = vpop.eup %1132  ;;  %v651_v16 = vsel %vm26_vm1, %v611_v5, 0.0  ;;  %v614_v17 = vmul.f32 %v1131_v8, %v1368_v53  ;;  %1152 = vtanh.f32 %v566_v20  ;;  %v510_v40 = vld [vmem:[#allocation2 + $0x68] sm:$0xff]  ;;  %v567_v54 = vadd.f32 %v1337_v49, %v528_v47 }
  0xf3   :  { %v1135_v19 = vpop.eup %1134  ;;  %v708_v24 = vsel %vm26_vm1, %v630_v12, 0.0  ;;  %v628_v25 = vmul.f32 %v1133_v15, %v1368_v53  ;;  %1154 = vtanh.f32 %v550_v22  ;;  %v526_v37 = vld [vmem:[#allocation2 + $0xe8] sm:$0xff]  ;;  %v549_v46 = vadd.f32 %v1337_v49, %v510_v40 }
  0xf4   :  { %691 = vadd.xlane.f32.xlu1 %v690_v57  ;;  %v1137_v21 = vpop.eup %1136  ;;  %v660_v26 = vsel %vm26_vm1, %v614_v17, 0.0  ;;  %v612_v27 = vmul.f32 %v1135_v19, %v1368_v53  ;;  %1156 = vtanh.f32 %v564_v33  ;;  %v565_v43 = vadd.f32 %v1337_v49, %v526_v37 }
  0xf5   :  { %643 = vadd.xlane.f32.xlu0 %v642_v59  ;;  %v1139_v23 = vpop.eup %1138  ;;  %v633_v29 = vmul.f32 %v1137_v21, %v1368_v53  ;;  %v702_v32 = vsel %vm26_vm1, %v628_v25, 0.0  ;;  %1158 = vtanh.f32 %v548_v36  ;;  %v551_v58 = vadd.f32 %v1337_v49, %v512_v50 }
  0xf6   :  { %v617_v31 = vmul.f32 %v1139_v23, %v1368_v53  ;;  %v654_v35 = vsel %vm26_vm1, %v612_v27, 0.0  ;;  %1160 = vtanh.f32 %v565_v43 }
  0xf7   :  { %v717_v39 = vsel %vm26_vm1, %v633_v29, 0.0  ;;  %1162 = vtanh.f32 %v549_v46 }
  0xf8   :  { %706 = vadd.xlane.f32.xlu1 %v705_v63  ;;  %v1141_v34 = vpop.eup %1140  ;;  %v669_v41 = vsel %vm26_vm1, %v617_v31, 0.0  ;;  %1164 = vtanh.f32 %v567_v54 }
  0xf9   :  { %658 = vadd.xlane.f32.xlu0 %v657_v1  ;;  %v1143_v38 = vpop.eup %1142  ;;  %v631_v42 = vmul.f32 %v1141_v34, %v1368_v53  ;;  %1166 = vtanh.f32 %v551_v58  ;;  %v769_v34 = vlaneseq }
  0xfa   :  { %v1145_v44 = vpop.eup %1144  ;;  %v615_v45 = vmul.f32 %v1143_v38, %v1368_v53 }
  0xfb   :  { %v1147_v48 = vpop.eup %1146  ;;  %v711_v51 = vsel %vm26_vm1, %v631_v42, 0.0  ;;  %v634_v52 = vmul.f32 %v1145_v44, %v1368_v53  ;;  %v1470_v36 = vand.u32 127, %v769_v34  ;;  %v1475_v40 = vshrl.u32 %v769_v34, 7 }
  0xfc   :  { %700 = vadd.xlane.f32.xlu1 %v699_v11  ;;  %v663_v56 = vsel %vm26_vm1, %v615_v45, 0.0  ;;  %v618_v57 = vmul.f32 %v1147_v48, %v1368_v53 }
  0xfd   :  { %652 = vadd.xlane.f32.xlu0 %v651_v16  ;;  %v1149_v55 = vpop.eup %1148  ;;  %v720_v62 = vsel %vm26_vm1, %v634_v52, 0.0  ;;  %v775_v38 = vadd.s32 4294967288, %v1470_v36  ;;  %v782_v43 = vadd.s32 4294967280, %v1470_v36  ;;  %v773_v45 = vsub.s32 %v1470_v36, %v1475_v40 }
  0xfe   :  { %v1151_v59 = vpop.eup %1150  ;;  %v632_v63 = vmul.f32 %v1149_v55, %v1368_v53  ;;  %v672_v0 = vsel %vm26_vm1, %v618_v57, 0.0  ;;  %v796_v47 = vadd.s32 4294967264, %v1470_v36  ;;  %v789_v48 = vadd.s32 4294967272, %v1470_v36 }
  0xff   :  { %v1153_v60 = vpop.eup %1152  ;;  %v616_v1 = vmul.f32 %v1151_v59, %v1368_v53  ;;  %v778_v42 = vsub.s32 %v775_v38, %v1475_v40  ;;  %v785_v52 = vsub.s32 %v782_v43, %v1475_v40 }
 0x100   :  { %709 = vadd.xlane.f32.xlu1 %v708_v24  ;;  %v1155_v61 = vpop.eup %1154  ;;  %v637_v2 = vmul.f32 %v1153_v60, %v1368_v53  ;;  %v714_v3 = vsel %vm26_vm1, %v632_v63, 0.0  ;;  %v799_v59 = vsub.s32 %v796_v47, %v1475_v40  ;;  %v792_v60 = vsub.s32 %v789_v48, %v1475_v40 }
 0x101   :  { %661 = vadd.xlane.f32.xlu0 %v660_v26  ;;  %v621_v49 = vmul.f32 %v1155_v61, %v1368_v53  ;;  %v1157_v4 = vpop.eup %1156  ;;  %v666_v5 = vsel %vm26_vm1, %v616_v1, 0.0  ;;  %v810_v1 = vadd.s32 4294967248, %v1470_v36 }
 0x102   :  { %v1159_v6 = vpop.eup %1158  ;;  %v729_v7 = vsel %vm26_vm1, %v637_v2, 0.0  ;;  %v635_v9 = vmul.f32 %v1157_v4, %v1368_v53 }
 0x103   :  { %v681_v8 = vsel %vm26_vm1, %v621_v49, 0.0  ;;  %v1161_v10 = vpop.eup %1160  ;;  %v619_v11 = vmul.f32 %v1159_v6, %v1368_v53 }
 0x104   :  { %703 = vadd.xlane.f32.xlu1 %v702_v32  ;;  %v1163_v12 = vpop.eup %1162  ;;  %v723_v13 = vsel %vm26_vm1, %v635_v9, 0.0  ;;  %v636_v14 = vmul.f32 %v1161_v10, %v1368_v53 }
 0x105   :  { %655 = vadd.xlane.f32.xlu0 %v654_v35  ;;  %v1165_v15 = vpop.eup %1164  ;;  %v675_v16 = vsel %vm26_vm1, %v619_v11, 0.0  ;;  %v620_v17 = vmul.f32 %v1163_v12, %v1368_v53 }
 0x106   :  { %v1167_v18 = vpop.eup %1166  ;;  %v726_v19 = vsel %vm26_vm1, %v636_v14, 0.0  ;;  %v638_v20 = vmul.f32 %v1165_v15, %v1368_v53  ;;  %v813_v14 = vsub.s32 %v810_v1, %v1475_v40  ;;  %v873_v1 = vadd.s32 4294967176, %v1470_v36 }
 0x107   :  { %v678_v21 = vsel %vm26_vm1, %v620_v17, 0.0  ;;  %v622_v22 = vmul.f32 %v1167_v18, %v1368_v53 }
 0x108   :  { %718 = vadd.xlane.f32.xlu1 %v717_v39  ;;  %v732_v23 = vsel %vm26_vm1, %v638_v20, 0.0 }
 0x109   :  { %670 = vadd.xlane.f32.xlu0 %v669_v41  ;;  %v684_v24 = vsel %vm26_vm1, %v622_v22, 0.0  ;;  %vm959_vm1 = vcmask 1041409  }
 0x10c   :  { %712 = vadd.xlane.f32.xlu1 %v711_v51  ;;  %v803_v51 = vadd.s32 4294967256, %v1470_v36 }
 0x10d   :  { %664 = vadd.xlane.f32.xlu0 %v663_v56 }
 0x110   :  { %721 = vadd.xlane.f32.xlu1 %v720_v62  ;;  %v806_v62 = vsub.s32 %v803_v51, %v1475_v40 }
 0x111   :  { %673 = vadd.xlane.f32.xlu0 %v672_v0 }
 0x114   :  { %715 = vadd.xlane.f32.xlu1 %v714_v3  ;;  %v817_v3 = vadd.s32 4294967240, %v1470_v36 }
 0x115   :  { %667 = vadd.xlane.f32.xlu0 %v666_v5 }
 0x118   :  { %730 = vadd.xlane.f32.xlu1 %v729_v7  ;;  %v824_v7 = vadd.s32 4294967232, %v1470_v36 }
 0x119   :  { %682 = vadd.xlane.f32.xlu0 %v681_v8  ;;  %v831_v8 = vadd.s32 4294967224, %v1470_v36 }
 0x11a   :  { %v827_v22 = vsub.s32 %v824_v7, %v1475_v40 }
 0x11c   :  { %724 = vadd.xlane.f32.xlu1 %v723_v13 }
 0x11d   :  { %676 = vadd.xlane.f32.xlu0 %v675_v16 }
 0x120   :  { %727 = vadd.xlane.f32.xlu1 %v726_v19 }
 0x121   :  { %679 = vadd.xlane.f32.xlu0 %v678_v21  ;;  %v820_v21 = vsub.s32 %v817_v3, %v1475_v40 }
 0x124   :  { %733 = vadd.xlane.f32.xlu1 %v732_v23 }
 0x125   :  { %685 = vadd.xlane.f32.xlu0 %v684_v24 }
 0x171   :  { %v695_v25 = vpop.xlane.xlu1 %694 }
 0x172   :  { %v647_v26 = vpop.xlane.xlu0 %646  ;;  %v892_v63 = vrot.slane %v695_v25, %v785_v52  ;;  %v834_v25 = vsub.s32 %v831_v8, %v1475_v40 }
 0x173   :  { %v786_v49 = vrot.slane %v647_v26, %v785_v52 }
 0x175   :  { %v689_v27 = vpop.xlane.xlu1 %688 }
 0x176   :  { %v641_v28 = vpop.xlane.xlu0 %640  ;;  %v883_v56 = vrot.slane %v689_v27, %v773_v45 }
 0x177   :  { %v774_v58 = vrot.slane %v641_v28, %v773_v45  ;;  %v838_v28 = vadd.s32 4294967216, %v1470_v36 }
 0x179   :  { %v698_v29 = vpop.xlane.xlu1 %697 }
 0x17a   :  { %v650_v30 = vpop.xlane.xlu0 %649  ;;  %v897_v9 = vrot.slane %v698_v29, %v792_v60 }
 0x17b   :  { %v793_v13 = vrot.slane %v650_v30, %v792_v60  ;;  %v866_v60 = vadd.s32 4294967184, %v1470_v36 }
 0x17d   :  { %v692_v31 = vpop.xlane.xlu1 %691 }
 0x17e   :  { %v644_v32 = vpop.xlane.xlu0 %643  ;;  %v887_v50 = vrot.slane %v692_v31, %v778_v42 }
 0x17f   :  { %v779_v54 = vrot.slane %v644_v32, %v778_v42 }
 0x180   :  { %v888_v61 = vsel %vm780_vm2, %v887_v50, %v883_v56  ;;  %v859_v50 = vadd.s32 4294967192, %v1470_v36 }
 0x181   :  { %v1466_v33 = vpop.xlane.xlu1 %706  ;;  %v781_v0 = vsel %vm780_vm2, %v779_v54, %v774_v58  ;;  %v893_v5 = vsel %vm787_vm3, %v892_v63, %v888_v61 }
 0x182   :  { %v1468_v35 = vpop.xlane.xlu0 %658  ;;  %v788_v10 = vsel %vm787_vm3, %v786_v49, %v781_v0  ;;  %v898_v17 = vsel %vm794_vm4, %v897_v9, %v893_v5  ;;  %v912_v26 = vrot.slane %v1466_v33, %v813_v14  ;;  %v862_v0 = vsub.s32 %v859_v50, %v1475_v40 }
 0x183   :  { %v795_v20 = vsel %vm794_vm4, %v793_v13, %v788_v10  ;;  %v814_v30 = vrot.slane %v1468_v35, %v813_v14  ;;  %v841_v35 = vsub.s32 %v838_v28, %v1475_v40  ;;  %v876_v10 = vsub.s32 %v873_v1, %v1475_v40 }
 0x184   :  { %vm963_vm3 = vcmask 1041408  }
 0x185   :  { %v701_v53 = vpop.xlane.xlu1 %700 }
 0x186   :  { %v653_v37 = vpop.xlane.xlu0 %652  ;;  %v902_v6 = vrot.slane %v701_v53, %v799_v59  ;;  %v845_v53 = vadd.s32 4294967208, %v1470_v36 }
 0x187   :  { %v800_v11 = vrot.slane %v653_v37, %v799_v59  ;;  %v852_v37 = vadd.s32 4294967200, %v1470_v36 }
 0x188   :  { %v903_v19 = vsel %vm801_vm5, %v902_v6, %v898_v17  ;;  %v869_v6 = vsub.s32 %v866_v60, %v1475_v40 }
 0x189   :  { %v1473_v39 = vpop.xlane.xlu1 %709  ;;  %v802_v23 = vsel %vm801_vm5, %v800_v11, %v795_v20  ;;  %v855_v52 = vsub.s32 %v852_v37, %v1475_v40 }
 0x18a   :  { %v1477_v41 = vpop.xlane.xlu0 %661  ;;  %v917_v38 = vrot.slane %v1473_v39, %v820_v21 }
 0x18d   :  { %v704_v44 = vpop.xlane.xlu1 %703 }
 0x18e   :  { %v656_v46 = vpop.xlane.xlu0 %655  ;;  %v907_v12 = vrot.slane %v704_v44, %v806_v62  ;;  %v821_v44 = vrot.slane %v1477_v41, %v820_v21  ;;  %v848_v41 = vsub.s32 %v845_v53, %v1475_v40 }
 0x18f   :  { %v807_v15 = vrot.slane %v656_v46, %v806_v62 }
 0x190   :  { %v908_v24 = vsel %vm808_vm6, %v907_v12, %v903_v19 }
 0x191   :  { %v1487_v55 = vpop.xlane.xlu1 %718  ;;  %v809_v27 = vsel %vm808_vm6, %v807_v15, %v802_v23  ;;  %v913_v32 = vsel %vm815_vm7, %v912_v26, %v908_v24 }
 0x192   :  { %v1489_v57 = vpop.xlane.xlu0 %670  ;;  %v816_v33 = vsel %vm815_vm7, %v814_v30, %v809_v27  ;;  %v918_v47 = vsel %vm822_vm8, %v917_v38, %v913_v32  ;;  %v932_v58 = vrot.slane %v1487_v55, %v841_v35 }
 0x193   :  { %v823_v39 = vsel %vm822_vm8, %v821_v44, %v816_v33  ;;  %v842_v62 = vrot.slane %v1489_v57, %v841_v35 }
 0x195   :  { %v713_v2 = vpop.xlane.xlu1 %712 }
 0x196   :  { %v665_v4 = vpop.xlane.xlu0 %664  ;;  %v922_v34 = vrot.slane %v713_v2, %v827_v22 }
 0x197   :  { %v828_v42 = vrot.slane %v665_v4, %v827_v22 }
 0x198   :  { %v923_v51 = vsel %vm829_vm9, %v922_v34, %v918_v47 }
 0x199   :  { %v1501_v16 = vpop.xlane.xlu1 %721  ;;  %v830_v54 = vsel %vm829_vm9, %v828_v42, %v823_v39 }
 0x19a   :  { %v1504_v18 = vpop.xlane.xlu0 %673  ;;  %v937_v3 = vrot.slane %v1501_v16, %v848_v41 }
 0x19b   :  { %v849_v55 = vrot.slane %v1504_v18, %v848_v41  ;;  %v735_v18 = vld [vmem:[%s1545_s1] sm:$0x3]  ;;  %s1195_s1 = smov [#allocation3]  }
 0x19c   :  { %vm736_vm2 = vcmp.ne.s32.totalorder %v735_v18, 0  ;;  %s982_s30 = sshll.u32 %s1195_s1, 4  ;;  %s983_s30 = int_to_ptr.vmem [resolvable:$true] %s982_s30 }
 0x19d   :  { %v716_v29 = vpop.xlane.xlu1 %715  ;;  %s1172_s6 = scalar_lea.vmem %s983_s30, 32  ;;  %p1177_p1 = scmp.lt.s32.totalorder %s983_s30, %s983_s30 }
 0x19e   :  { %v668_v31 = vpop.xlane.xlu0 %667  ;;  %v927_v43 = vrot.slane %v716_v29, %v834_v25  ;;  %p1173_p0 = scmp.ne.s32.totalorder %s983_s30, %s1172_s6  ;;  %p1178_p2 = scmp.lt.s32.totalorder %s1172_s6, %s1172_s6 }
 0x19f   :  { %v835_v45 = vrot.slane %v668_v31, %v834_v25 }
 0x1a0   :  { %v928_v56 = vsel %vm836_vm10, %v927_v43, %v923_v51  ;;  %p1179_p3 = por %p1178_p2, %p1177_p1 }
 0x1a1   :  { %v731_v46 = vpop.xlane.xlu1 %730  ;;  %v837_v59 = vsel %vm836_vm10, %v835_v45, %v830_v54  ;;  %v933_v2 = vsel %vm843_vm11, %v932_v58, %v928_v56 }
 0x1a2   :  { %v683_v48 = vpop.xlane.xlu0 %682  ;;  %v844_v4 = vsel %vm843_vm11, %v842_v62, %v837_v59  ;;  %v938_v57 = vsel %vm850_vm12, %v937_v3, %v933_v2  ;;  %v952_v15 = vrot.slane %v731_v46, %v869_v6  ;;  %p1180_p4 = pnand %p1179_p3, %p1173_p0 }
 0x1a3   :  { %v851_v11 = vsel %vm850_vm12, %v849_v55, %v844_v4  ;;  %v870_v19 = vrot.slane %v683_v48, %v869_v6 }
 0x1a5   :  { %v725_v61 = vpop.xlane.xlu1 %724 }
 0x1a6   :  { %v677_v63 = vpop.xlane.xlu0 %676  ;;  %v942_v49 = vrot.slane %v725_v61, %v855_v52 }
 0x1a7   :  { %v856_v5 = vrot.slane %v677_v63, %v855_v52 }
 0x1a8   :  { %v943_v36 = vsel %vm857_vm13, %v942_v49, %v938_v57 }
 0x1a9   :  { %v728_v7 = vpop.xlane.xlu1 %727  ;;  %v858_v13 = vsel %vm857_vm13, %v856_v5, %v851_v11 }
 0x1aa   :  { %v947_v8 = vrot.slane %v728_v7, %v862_v0  ;;  %v680_v9 = vpop.xlane.xlu0 %679 }
 0x1ab   :  { %v863_v12 = vrot.slane %v680_v9, %v862_v0 }
 0x1ac   :  { %v948_v14 = vsel %vm864_vm14, %v947_v8, %v943_v36 }
 0x1ad   :  { %v865_v16 = vsel %vm864_vm14, %v863_v12, %v858_v13  ;;  %v734_v17 = vpop.xlane.xlu1 %733  ;;  %v953_v23 = vsel %vm871_vm15, %v952_v15, %v948_v14 }
 0x1ae   :  { %v957_v20 = vrot.slane %v734_v17, %v876_v10  ;;  %v686_v21 = vpop.xlane.xlu0 %685  ;;  %v872_v40 = vsel %vm871_vm15, %v870_v19, %v865_v16 }
 0x1af   :  { %v877_v22 = vrot.slane %v686_v21, %v876_v10 }
 0x1b0   :  { %v958_v24 = vsel %vm878_vm0, %v957_v20, %v953_v23 }
 0x1b1   :  { %v879_v25 = vsel %vm878_vm0, %v877_v22, %v872_v40 }
 0x1b2   :  { %v960_v26 = vsel %vm959_vm1, %v958_v24, %v879_v25 }
 0x1b3   :  { %v962_v27 = vsel %vm736_vm2, -inf, %v960_v26 }
 0x1b4   :  { %v964_v28 = vsel %vm963_vm3, %v962_v27, -inf }
 0x1b5   :  { %965 = vmax.xlane.f32.xlu0 %v964_v28 }
 0x23e   :  { %v966_v29 = vpop.xlane.xlu0 %965 }
 0x23f   :  { %v967_v30 = vsub.f32 %v962_v27, %v966_v29 }
 0x241   :  { %v968_v31 = vmul.f32 1.442695, %v967_v30 }
 0x243   :  { %1168 = vpow2.f32 %v968_v31 }
 0x250   :  { %v1169_v32 = vpop.eup %1168 }
 0x251   :  { %v970_v34 = vsel %vm963_vm3, %v1169_v32, 0.0 }
 0x252   :  { %971 = vadd.xlane.f32.xlu1 %v970_v34 }
 0x2db   :  { %v972_v53 = vpop.xlane.xlu1 %971 }
 0x2dc   :  { %1170 = vrcp.f32 %v972_v53 }
 0x2e9   :  { %v1171_v37 = vpop.eup %1170 }
 0x2ea   :  { %v974_v38 = vmul.f32 %v1171_v37, %v1169_v32 }
 0x2ec   :  { %975 = vst [vmem:[#allocation3] sm:$0x3] %v974_v38 }
 0x2ed   :  { %1183 = shalt.err (!%p1180_p4)
}
 0x2ee   :  { %985 = dma.vmem_to_hbm [thread:$0]  %s983_s30, 32, %s1549_s5, [#allocation4]  }
 0x2ef   :  { %1192 = dma.done.wait [#allocation4], 32  }
 0x2f0   :  { %1193 = vsyncadd [#allocation4], 4294967264 }
 0x2f1   :  { %989 = vsyncpa [#allocation4], 1 }

</bundles_post_ra>
